<compile_context>
chip_gen: v7x
topology: tpu7x:2x2x1
jax: 0.10.0
libtpu: 0.0.40
codegen_flags: <defaults>
</compile_context>

<pallas_src>
import jax
import jax.numpy as jnp
from jax.experimental import pallas as pl
from jax.experimental.pallas import tpu as pltpu


def _drr_ave_kernel(user_ref, item_ref, w_ref, b_ref, out_ref):
    # user_ref: (TB, E)    VMEM
    # item_ref: (TB, S, E) VMEM
    # w_ref:    (S,)       SMEM  (Conv1d weight (1, S, 1) flattened, f32)
    # b_ref:    (1,)       SMEM  (Conv1d bias, f32)
    # out_ref:  (TB, 3E)   VMEM
    s = item_ref.shape[1]

    # Conv1d(k=1, out_ch=1): weighted sum over S. Unrolled per-s f32 accumulation on
    # (TB, E) slices -- never materializes a full f32 copy of the item tile.
    acc = item_ref[:, 0, :].astype(jnp.float32) * w_ref[0]
    for k in range(1, s):
        acc = acc + item_ref[:, k, :].astype(jnp.float32) * w_ref[k]
    drr = acc + b_ref[0]                                   # (TB, E) f32

    user_f = user_ref[...].astype(jnp.float32)             # (TB, E) f32

    # Single lane-dense full-block store (no masked partial stores into shared vregs).
    out = jnp.concatenate([user_f, user_f * drr, drr], axis=-1)   # (TB, 3E)
    out_ref[...] = out.astype(out_ref.dtype)


def _round_up(x, m):
    return ((x + m - 1) // m) * m


def drr_ave_state_representation(user, item, weight, bias,
                                 vmem_block_budget_bytes=10 * 1024 * 1024):
    """user: (B, E), item: (B, S, E), weight: (1, S, 1), bias: (1,) -> (B, 3E)."""
    b, e = user.shape
    bi, s, ei = item.shape
    assert bi == b and ei == e, (user.shape, item.shape)

    w_vec = weight.reshape(s).astype(jnp.float32)          # (S,)  -> SMEM
    b_vec = bias.reshape(1).astype(jnp.float32)            # (1,)  -> SMEM

    itemsize = jnp.dtype(user.dtype).itemsize

    # Pick the batch tile TB from a per-buffer VMEM budget, accounting for the
    # (8, 128) layout padding of the last two dims of every block.
    e_pad = _round_up(e, 128)
    e3_pad = _round_up(3 * e, 128)
    s_pad = _round_up(s, 8)
    per_row_bytes = (s_pad * e_pad + e_pad + e3_pad) * itemsize
    tb = max(1, int(vmem_block_budget_bytes // per_row_bytes))
    if tb >= b:
        tb = b                                   # full-extent block (any B allowed)
    else:
        tb = max(8, (tb // 8) * 8)               # sublane-aligned partial blocks
    grid = (pl.cdiv(b, tb),)

    flops = 2 * b * s * e + b * e
    bytes_accessed = (b * s * e + b * e + b * 3 * e) * itemsize + (s + 1) * 4

    return pl.pallas_call(
        _drr_ave_kernel,
        out_shape=jax.ShapeDtypeStruct((b, 3 * e), user.dtype),
        grid=grid,
        in_specs=[
            pl.BlockSpec((tb, e), lambda i: (i, 0)),        # user
            pl.BlockSpec((tb, s, e), lambda i: (i, 0, 0)),  # item
            pl.BlockSpec(memory_space=pltpu.SMEM),          # conv weight scalars
            pl.BlockSpec(memory_space=pltpu.SMEM),          # conv bias scalar
        ],
        out_specs=pl.BlockSpec((tb, 3 * e), lambda i: (i, 0)),
        compiler_params=pltpu.CompilerParams(
            dimension_semantics=("parallel",),
            vmem_limit_bytes=32 * 1024 * 1024,
        ),
        cost_estimate=pl.CostEstimate(
            flops=flops, transcendentals=0, bytes_accessed=bytes_accessed),
    )(user, item, w_vec, b_vec)


def _reference(user, item, weight, bias):
    # Pure-JAX reference of the PyTorch forward.
    drr = jnp.einsum("bse,s->be", item.astype(jnp.float32),
                     weight.reshape(-1).astype(jnp.float32)) + bias.reshape(())
    drr = drr.astype(user.dtype)
    return jnp.concatenate([user, user * drr, drr], axis=1)


if __name__ == "__main__":
    batch = 2
    state_size = 8        # in_channels of the Conv1d
    embedding_dim = 32

    key = jax.random.PRNGKey(0)
    k_user, k_item, k_w, k_u2, k_i2 = jax.random.split(key, 5)

    user = jax.random.normal(k_user, (batch, embedding_dim), dtype=jnp.float32)
    item = jax.random.normal(k_item, (batch, state_size, embedding_dim),
                             dtype=jnp.float32)

    # Parameter init mirroring the module's initialize():
    #   nn.init.uniform_(weight) -> U[0, 1);  bias zeroed.
    weight = jax.random.uniform(k_w, (1, state_size, 1), dtype=jnp.float32)
    bias = jnp.zeros((1,), dtype=jnp.float32)

    out = jax.block_until_ready(drr_ave_state_representation(user, item, weight, bias))
    ref = _reference(user, item, weight, bias)
    assert out.shape == (batch, 3 * embedding_dim), out.shape
    assert jnp.allclose(out, ref, atol=1e-5, rtol=1e-5), "mismatch vs reference (small)"

    # Second check: larger batch with a tiny VMEM budget to force TB<B, exercising the
    # multi-block parallel grid (including a non-divisible final block).
    b2 = 20
    user2 = jax.random.normal(k_u2, (b2, embedding_dim), dtype=jnp.float32)
    item2 = jax.random.normal(k_i2, (b2, state_size, embedding_dim), dtype=jnp.float32)
    out2 = jax.block_until_ready(
        drr_ave_state_representation(user2, item2, weight, bias,
                                     vmem_block_budget_bytes=48 * 1024))
    ref2 = _reference(user2, item2, weight, bias)
    assert out2.shape == (b2, 3 * embedding_dim), out2.shape
    assert jnp.allclose(out2, ref2, atol=1e-5, rtol=1e-5), "mismatch vs reference (tiled)"

    print("KERNEL_OK")
</pallas_src>

<mosaic_0001>
module attributes {stable_mosaic.version = 11 : i64} {
  func.func @_drr_ave_kernel(%arg0: i32, %arg1: memref<2x32xf32, #tpu.memory_space<vmem>>, %arg2: memref<2x8x32xf32, #tpu.memory_space<vmem>>, %arg3: memref<8xf32, #tpu.memory_space<smem>>, %arg4: memref<1xf32, #tpu.memory_space<smem>>, %arg5: memref<2x96xf32, #tpu.memory_space<vmem>>) attributes {dimension_semantics = [#tpu.dimension_semantics<parallel>], iteration_bounds = array<i64: 1>, scalar_prefetch = 0 : i64, scratch_operands = 0 : i64, tpu.core_type = #tpu.core_type<tc>, window_params = [{transform_indices = @transform_0, window_bounds = array<i64: 2, 32>}, {transform_indices = @transform_1, window_bounds = array<i64: 2, 8, 32>}, {transform_indices = @transform_2, window_bounds = array<i64: 8>}, {transform_indices = @transform_3, window_bounds = array<i64: 1>}, {transform_indices = @transform_4, window_bounds = array<i64: 2, 96>}]} {
    %c0 = arith.constant 0 : index
    %c0_0 = arith.constant 0 : index
    %c0_1 = arith.constant 0 : index
    %0 = vector.load %arg2[%c0, %c0_0, %c0_1] : memref<2x8x32xf32, #tpu.memory_space<vmem>>, vector<2x1x32xf32>
    %1 = vector.shape_cast %0 : vector<2x1x32xf32> to vector<2x32xf32>
    %c0_2 = arith.constant 0 : index
    %2 = memref.load %arg3[%c0_2] : memref<8xf32, #tpu.memory_space<smem>>
    %3 = vector.broadcast %2 : f32 to vector<2x32xf32>
    %4 = arith.mulf %1, %3 : vector<2x32xf32>
    %c0_3 = arith.constant 0 : index
    %c1 = arith.constant 1 : index
    %c0_4 = arith.constant 0 : index
    %5 = vector.load %arg2[%c0_3, %c1, %c0_4] : memref<2x8x32xf32, #tpu.memory_space<vmem>>, vector<2x1x32xf32>
    %6 = vector.shape_cast %5 : vector<2x1x32xf32> to vector<2x32xf32>
    %c1_5 = arith.constant 1 : index
    %7 = memref.load %arg3[%c1_5] : memref<8xf32, #tpu.memory_space<smem>>
    %8 = vector.broadcast %7 : f32 to vector<2x32xf32>
    %9 = arith.mulf %6, %8 : vector<2x32xf32>
    %10 = arith.addf %4, %9 : vector<2x32xf32>
    %c0_6 = arith.constant 0 : index
    %c2 = arith.constant 2 : index
    %c0_7 = arith.constant 0 : index
    %11 = vector.load %arg2[%c0_6, %c2, %c0_7] : memref<2x8x32xf32, #tpu.memory_space<vmem>>, vector<2x1x32xf32>
    %12 = vector.shape_cast %11 : vector<2x1x32xf32> to vector<2x32xf32>
    %c2_8 = arith.constant 2 : index
    %13 = memref.load %arg3[%c2_8] : memref<8xf32, #tpu.memory_space<smem>>
    %14 = vector.broadcast %13 : f32 to vector<2x32xf32>
    %15 = arith.mulf %12, %14 : vector<2x32xf32>
    %16 = arith.addf %10, %15 : vector<2x32xf32>
    %c0_9 = arith.constant 0 : index
    %c3 = arith.constant 3 : index
    %c0_10 = arith.constant 0 : index
    %17 = vector.load %arg2[%c0_9, %c3, %c0_10] : memref<2x8x32xf32, #tpu.memory_space<vmem>>, vector<2x1x32xf32>
    %18 = vector.shape_cast %17 : vector<2x1x32xf32> to vector<2x32xf32>
    %c3_11 = arith.constant 3 : index
    %19 = memref.load %arg3[%c3_11] : memref<8xf32, #tpu.memory_space<smem>>
    %20 = vector.broadcast %19 : f32 to vector<2x32xf32>
    %21 = arith.mulf %18, %20 : vector<2x32xf32>
    %22 = arith.addf %16, %21 : vector<2x32xf32>
    %c0_12 = arith.constant 0 : index
    %c4 = arith.constant 4 : index
    %c0_13 = arith.constant 0 : index
    %23 = vector.load %arg2[%c0_12, %c4, %c0_13] : memref<2x8x32xf32, #tpu.memory_space<vmem>>, vector<2x1x32xf32>
    %24 = vector.shape_cast %23 : vector<2x1x32xf32> to vector<2x32xf32>
    %c4_14 = arith.constant 4 : index
    %25 = memref.load %arg3[%c4_14] : memref<8xf32, #tpu.memory_space<smem>>
    %26 = vector.broadcast %25 : f32 to vector<2x32xf32>
    %27 = arith.mulf %24, %26 : vector<2x32xf32>
    %28 = arith.addf %22, %27 : vector<2x32xf32>
    %c0_15 = arith.constant 0 : index
    %c5 = arith.constant 5 : index
    %c0_16 = arith.constant 0 : index
    %29 = vector.load %arg2[%c0_15, %c5, %c0_16] : memref<2x8x32xf32, #tpu.memory_space<vmem>>, vector<2x1x32xf32>
    %30 = vector.shape_cast %29 : vector<2x1x32xf32> to vector<2x32xf32>
    %c5_17 = arith.constant 5 : index
    %31 = memref.load %arg3[%c5_17] : memref<8xf32, #tpu.memory_space<smem>>
    %32 = vector.broadcast %31 : f32 to vector<2x32xf32>
    %33 = arith.mulf %30, %32 : vector<2x32xf32>
    %34 = arith.addf %28, %33 : vector<2x32xf32>
    %c0_18 = arith.constant 0 : index
    %c6 = arith.constant 6 : index
    %c0_19 = arith.constant 0 : index
    %35 = vector.load %arg2[%c0_18, %c6, %c0_19] : memref<2x8x32xf32, #tpu.memory_space<vmem>>, vector<2x1x32xf32>
    %36 = vector.shape_cast %35 : vector<2x1x32xf32> to vector<2x32xf32>
    %c6_20 = arith.constant 6 : index
    %37 = memref.load %arg3[%c6_20] : memref<8xf32, #tpu.memory_space<smem>>
    %38 = vector.broadcast %37 : f32 to vector<2x32xf32>
    %39 = arith.mulf %36, %38 : vector<2x32xf32>
    %40 = arith.addf %34, %39 : vector<2x32xf32>
    %c0_21 = arith.constant 0 : index
    %c7 = arith.constant 7 : index
    %c0_22 = arith.constant 0 : index
    %41 = vector.load %arg2[%c0_21, %c7, %c0_22] : memref<2x8x32xf32, #tpu.memory_space<vmem>>, vector<2x1x32xf32>
    %42 = vector.shape_cast %41 : vector<2x1x32xf32> to vector<2x32xf32>
    %c7_23 = arith.constant 7 : index
    %43 = memref.load %arg3[%c7_23] : memref<8xf32, #tpu.memory_space<smem>>
    %44 = vector.broadcast %43 : f32 to vector<2x32xf32>
    %45 = arith.mulf %42, %44 : vector<2x32xf32>
    %46 = arith.addf %40, %45 : vector<2x32xf32>
    %c0_24 = arith.constant 0 : index
    %47 = memref.load %arg4[%c0_24] : memref<1xf32, #tpu.memory_space<smem>>
    %48 = vector.broadcast %47 : f32 to vector<2x32xf32>
    %49 = arith.addf %46, %48 : vector<2x32xf32>
    %c0_25 = arith.constant 0 : index
    %c0_26 = arith.constant 0 : index
    %50 = vector.load %arg1[%c0_25, %c0_26] : memref<2x32xf32, #tpu.memory_space<vmem>>, vector<2x32xf32>
    %51 = arith.mulf %50, %49 : vector<2x32xf32>
    %52 = tpu.concatenate %50, %51, %49 in 1 : vector<2x32xf32>, vector<2x32xf32>, vector<2x32xf32> -> vector<2x96xf32>
    %c0_27 = arith.constant 0 : index
    %c0_28 = arith.constant 0 : index
    %53 = vector.load %arg5[%c0_27, %c0_28] : memref<2x96xf32, #tpu.memory_space<vmem>>, vector<2x96xf32>
    tpu.vector_store %arg5[%c0_27, %c0_28], %52 {strides = array<i32>} : memref<2x96xf32, #tpu.memory_space<vmem>>, vector<2x96xf32>,
    return
  }
  func.func @transform_0(%arg0: i32) -> (i32, i32) {
    %c0_i32 = arith.constant 0 : i32
    %c0_i32_0 = arith.constant 0 : i32
    return %arg0, %c0_i32 : i32, i32
  }
  func.func @transform_1(%arg0: i32) -> (i32, i32, i32) {
    %c0_i32 = arith.constant 0 : i32
    %c0_i32_0 = arith.constant 0 : i32
    %c0_i32_1 = arith.constant 0 : i32
    return %arg0, %c0_i32, %c0_i32_0 : i32, i32, i32
  }
  func.func @transform_2(%arg0: i32) -> i32 {
    %c0_i32 = arith.constant 0 : i32
    %c0_i32_0 = arith.constant 0 : i32
    return %c0_i32 : i32
  }
  func.func @transform_3(%arg0: i32) -> i32 {
    %c0_i32 = arith.constant 0 : i32
    %c0_i32_0 = arith.constant 0 : i32
    return %c0_i32 : i32
  }
  func.func @transform_4(%arg0: i32) -> (i32, i32) {
    %c0_i32 = arith.constant 0 : i32
    %c0_i32_0 = arith.constant 0 : i32
    return %arg0, %c0_i32 : i32, i32
  }
}

</mosaic_0001>

<bundles_post_ra>
// kernel: tpu_custom_call.1
= control target key start
LH: loop header
LB: loop body
LE: loop exit
PB: predicated region body
PF: predicated region fallthrough
CT: control target
= control target key end

     0   :  { %10 = vsyncpa [#allocation4], 0  ;;  %s302_s0 = inlined_call_operand.vmem [shape: f32[2,32], index: 0, kind: input, shape index: {}]   ;;  %s303_s1 = inlined_call_operand.hbm [shape: f32[2,8,32], index: 1, kind: input, shape index: {}]   ;;  %s304_s2 = inlined_call_operand.vmem [shape: f32[8], index: 2, kind: input, shape index: {}]   ;;  %s305_s3 = inlined_call_operand.<no memory space> [shape: f32[1], index: 3, kind: input, shape index: {}]   ;;  %s306_s4 = inlined_call_operand.hbm [shape: f32[2,96], index: 4, kind: output, shape index: {}]  }
   0x1   :  { %11 = vsyncpa [#allocation6], 0 }
   0x2   :  { %12 = vsyncpa [#allocation5], 0  ;;  %s225_s15 = smov [#allocation3]   ;;  %s33_s19 = sshll.u32 %s304_s2, 4  ;;  %s34_s19 = int_to_ptr.vmem [resolvable:$true] %s33_s19 }
   0x3   :  { %s20_s16 = sshll.u32 %s225_s15, 4  ;;  %s163_s22 = scalar_lea.hbm %s303_s1, 256  ;;  %s21_s16 = int_to_ptr.vmem [resolvable:$true] %s20_s16 }
   0x4   :  { %p164_p0 = scmp.ne.s32.totalorder %s303_s1, %s163_s22  ;;  %p167_p1 = scmp.lt.u32.totalorder %s163_s22, %s303_s1 }
   0x6   :  { %p169_p2 = pnand %p167_p1, %p164_p0 }
   0x8   :  { %172 = shalt.err (!%p169_p2)
}
   0x9   :  { %s173_s27 = scalar_lea.vmem %s21_s16, 256  ;;  %p178_p4 = scmp.lt.s32.totalorder %s21_s16, %s21_s16 }
   0xa   :  { %p174_p3 = scmp.ne.s32.totalorder %s21_s16, %s173_s27  ;;  %p179_p5 = scmp.lt.s32.totalorder %s173_s27, %s173_s27 }
   0xc   :  { %p180_p6 = por %p179_p5, %p178_p4 }
   0xe   :  { %p181_p7 = pnand %p180_p6, %p174_p3 }
  0x10   :  { %184 = shalt.err (!%p181_p7)
}
  0x11   :  { %s226_s2 = smov 128   ;;  %s227_s28 = smov 8  }
  0x12   :  { %26 = dma.hbm_to_vmem [thread:$0]  %s303_s1, 256, %s21_s16, [#allocation4], %s226_s2, %s226_s2, %s227_s28  }
  0x13   :  { %s185_s5 = scalar_lea.vmem %s34_s19, 16  ;;  %p190_p9 = scmp.lt.s32.totalorder %s34_s19, %s34_s19 }
  0x14   :  { %p186_p8 = scmp.ne.s32.totalorder %s34_s19, %s185_s5  ;;  %p191_p10 = scmp.lt.s32.totalorder %s185_s5, %s185_s5 }
  0x16   :  { %p192_p11 = por %p191_p10, %p190_p9 }
  0x18   :  { %p193_p12 = pnand %p192_p11, %p186_p8 }
  0x1a   :  { %196 = shalt.err (!%p193_p12)
}
  0x1b   :  { %s228_s6 = smov [#allocation7]  }
  0x1c   :  { %36 = dma.vmem_to_smem %s34_s19, 16, %s228_s6, [#allocation6]  }
  0x1d   :  { %219 = dma.done.wait [#allocation4], 256  }
  0x1e   :  { %220 = vsyncadd [#allocation4], 4294967040 }
  0x1f   :  { %221 = dma.done.wait [#allocation6], 16  }
  0x20   :  { %222 = vsyncadd [#allocation6], 4294967280 }
  0x21   :  { %45 = sfence }
  0x22   :  { %s48_s7 = sld [smem:[#allocation7]]  ;;  %s149_s8 = sld [smem:[#allocation7 + $0x1]]  ;;  %v46_v0 = vld [vmem:[#allocation3] sm:$0x1]  ;;  %v47_v1 = vld [vmem:[#allocation3 + $0x8] sm:$0x1]  ;;  %v109_v52 = vstv %s305_s3 }
  0x23   :  { %s150_s9 = sld [smem:[#allocation7 + $0x2]]  ;;  %s151_s10 = sld [smem:[#allocation7 + $0x3]]  ;;  %v52_v2 = vld [vmem:[#allocation3 + $0x1] sm:$0x1]  ;;  %v53_v3 = vld [vmem:[#allocation3 + $0x9] sm:$0x1] }
  0x24   :  { %s272_s1 = sld [smem:[#allocation7 + $0x4]]  ;;  %s274_s11 = sld [smem:[#allocation7 + $0x5]]  ;;  %v60_v5 = vld [vmem:[#allocation3 + $0x2] sm:$0x1]  ;;  %v61_v6 = vld [vmem:[#allocation3 + $0xa] sm:$0x1] }
  0x25   :  { %s276_s12 = sld [smem:[#allocation7 + $0x6]]  ;;  %v68_v10 = vld [vmem:[#allocation3 + $0x3] sm:$0x1]  ;;  %v69_v11 = vld [vmem:[#allocation3 + $0xb] sm:$0x1]  ;;  %s278_s13 = sld [smem:[#allocation7 + $0x7]] }
  0x26   :  { %v76_v18 = vld [vmem:[#allocation3 + $0x4] sm:$0x1]  ;;  %v77_v19 = vld [vmem:[#allocation3 + $0xc] sm:$0x1]  ;;  %v84_v25 = vld [vmem:[#allocation3 + $0x5] sm:$0x1] }
  0x27   :  { %v85_v26 = vld [vmem:[#allocation3 + $0xd] sm:$0x1]  ;;  %v92_v32 = vld [vmem:[#allocation3 + $0x6] sm:$0x1]  ;;  %v93_v33 = vld [vmem:[#allocation3 + $0xe] sm:$0x1] }
  0x28   :  { %v49_v4 = vstv %s48_s7  ;;  %v55_v9 = vstv %s149_s8  ;;  %v100_v39 = vld [vmem:[#allocation3 + $0x7] sm:$0x1]  ;;  %v101_v40 = vld [vmem:[#allocation3 + $0xf] sm:$0x1]  ;;  %vm116_vm0 = vcmask 1041409   ;;  %s229_s18 = smov 32  }
  0x29   :  { %v50_v7 = vmul.f32 %v49_v4, %v46_v0  ;;  %v51_v8 = vmul.f32 %v49_v4, %v47_v1  ;;  %v56_v12 = vmul.f32 %v55_v9, %v52_v2  ;;  %v57_v13 = vmul.f32 %v55_v9, %v53_v3  ;;  %v112_v57 = vld [vmem:[%s302_s0] sm:$0x3]  ;;  %s230_s19 = smov 64   ;;  %s231_s20 = smov [#allocation8]  }
  0x2a   :  { %v63_v14 = vstv %s150_s9  ;;  %v71_v17 = vstv %s151_s10  ;;  %v79_v24 = vstv %s272_s1  ;;  %v87_v27 = vstv %s274_s11  ;;  %s139_s3 = sshll.u32 %s231_s20, 4  ;;  %s140_s3 = int_to_ptr.vmem [resolvable:$true] %s139_s3 }
  0x2b   :  { %v64_v15 = vmul.f32 %v63_v14, %v60_v5  ;;  %v65_v16 = vmul.f32 %v63_v14, %v61_v6  ;;  %v58_v20 = vadd.f32 %v56_v12, %v50_v7  ;;  %v59_v21 = vadd.f32 %v57_v13, %v51_v8  ;;  %s197_s21 = scalar_lea.vmem %s140_s3, 32  ;;  %p202_p0 = scmp.lt.s32.totalorder %s140_s3, %s140_s3 }
  0x2c   :  { %v72_v22 = vmul.f32 %v71_v17, %v68_v10  ;;  %v73_v23 = vmul.f32 %v71_v17, %v69_v11  ;;  %v80_v30 = vmul.f32 %v79_v24, %v76_v18  ;;  %v81_v31 = vmul.f32 %v79_v24, %v77_v19  ;;  %p198_p13 = scmp.ne.s32.totalorder %s140_s3, %s197_s21  ;;  %p203_p1 = scmp.lt.s32.totalorder %s197_s21, %s197_s21 }
  0x2d   :  { %v66_v28 = vadd.f32 %v64_v15, %v58_v20  ;;  %v67_v29 = vadd.f32 %v65_v16, %v59_v21  ;;  %v95_v34 = vstv %s276_s12  ;;  %v88_v37 = vmul.f32 %v87_v27, %v84_v25 }
  0x2e   :  { %v89_v38 = vmul.f32 %v87_v27, %v85_v26  ;;  %v103_v41 = vstv %s278_s13  ;;  %v96_v44 = vmul.f32 %v95_v34, %v92_v32  ;;  %v97_v45 = vmul.f32 %v95_v34, %v93_v33  ;;  %p204_p2 = por %p203_p1, %p202_p0 }
  0x2f   :  { %v74_v35 = vadd.f32 %v72_v22, %v66_v28  ;;  %v75_v36 = vadd.f32 %v73_v23, %v67_v29  ;;  %v104_v48 = vmul.f32 %v103_v41, %v100_v39  ;;  %v105_v49 = vmul.f32 %v103_v41, %v101_v40 }
  0x30   :  { %vm127_vm1 = vcmask 261120   ;;  %vm129_vm2 = vcmask 523264   ;;  %vm131_vm3 = vcmask 779264   ;;  %p205_p3 = pnand %p204_p2, %p198_p13 }
  0x31   :  { %v82_v42 = vadd.f32 %v80_v30, %v74_v35  ;;  %v83_v43 = vadd.f32 %v81_v31, %v75_v36 }
  0x33   :  { %v90_v46 = vadd.f32 %v88_v37, %v82_v42  ;;  %v91_v47 = vadd.f32 %v89_v38, %v83_v43 }
  0x35   :  { %v98_v50 = vadd.f32 %v96_v44, %v90_v46  ;;  %v99_v51 = vadd.f32 %v97_v45, %v91_v47 }
  0x37   :  { %v106_v53 = vadd.f32 %v104_v48, %v98_v50  ;;  %v107_v54 = vadd.f32 %v105_v49, %v99_v51 }
  0x39   :  { %v110_v55 = vadd.f32 %v109_v52, %v106_v53  ;;  %v111_v56 = vadd.f32 %v109_v52, %v107_v54 }
  0x3b   :  { %v115_v58 = vrot.slane %v111_v56, 7 }
  0x3d   :  { %v117_v59 = vsel %vm116_vm0, %v115_v58, %v110_v55 }
  0x3e   :  { %v119_v60 = vmul.f32 %v117_v59, %v112_v57 }
  0x40   :  { %121 = vrot.lane.b32.xlu0 %v119_v60, %s229_s18 }
  0x44   :  { %124 = vrot.lane.b32.xlu0 %v117_v59, %s230_s19 }
  0xb2   :  { %v122_v61 = vpop.permute.xlu0 %121 }
  0xb3   :  { %v128_v62 = vsel %vm127_vm1, %v112_v57, %v122_v61 }
  0xb6   :  { %v125_v63 = vpop.permute.xlu0 %124 }
  0xb7   :  { %v130_v0 = vsel %vm129_vm2, %v128_v62, %v125_v63 }
  0xb8   :  { %132 = vst.msk [vmem:[#allocation8] sm:$0x3] %vm131_vm3, %v130_v0 }
  0xb9   :  { %208 = shalt.err (!%p205_p3)
}
  0xba   :  { %s209_s23 = scalar_lea.hbm %s306_s4, 32 }
  0xbb   :  { %p210_p4 = scmp.ne.s32.totalorder %s306_s4, %s209_s23  ;;  %p213_p5 = scmp.lt.u32.totalorder %s209_s23, %s306_s4 }
  0xbd   :  { %p215_p6 = pnand %p213_p5, %p210_p4 }
  0xbf   :  { %218 = shalt.err (!%p215_p6)
}
  0xc0   :  { %142 = dma.vmem_to_hbm [thread:$0]  %s140_s3, 32, %s306_s4, [#allocation5]  }
  0xc1   :  { %223 = dma.done.wait [#allocation5], 32  }
  0xc2   :  { %224 = vsyncadd [#allocation5], 4294967264 }
  0xc3   :  { %146 = vsyncpa [#allocation4], 1 }
  0xc4   :  { %147 = vsyncpa [#allocation5], 1 }
  0xc5   :  { %148 = vsyncpa [#allocation6], 1 }

</bundles_post_ra>
